<compile_context>
chip_gen: v7x
topology: tpu7x:2x2x1
jax: 0.10.0
libtpu: 0.0.40
codegen_flags: <defaults>
</compile_context>

<pallas_src>
import functools

import jax
import jax.numpy as jnp
from jax import lax
from jax.experimental import pallas as pl
from jax.experimental.pallas import tpu as pltpu

EPS = 1e-12


# --------------------------------------------------------------------------
# Stage 1: power iteration -> scale = min(1, coeff / sigma)   (tiny kernel)
# --------------------------------------------------------------------------
def _scale_kernel(w_ref, u0_ref, scale_ref, *, n_spectral_iter, coeff):
    W = w_ref[...]                            # (Np, Kp), stored layout, matmul dtype
    u = u0_ref[...].astype(jnp.float32)       # (1, Np) lane-dense row vector

    def _normalize(z):
        # == F.normalize(z, eps=EPS): z / max(||z||, EPS), via EUP rsqrt
        n2 = jnp.sum(z * z)
        return z * lax.rsqrt(jnp.maximum(n2, jnp.float32(EPS * EPS)))

    def _uW(u):
        # v_row = (W^T u)^T = u_row @ W                     -> (1, Kp), f32 acc
        return jnp.dot(u.astype(W.dtype), W, preferred_element_type=jnp.float32)

    def _vWt(v):
        # u_row = (W v)^T : contract on the stored `in` axis, no transpose
        return lax.dot_general(v.astype(W.dtype), W, (((1,), (1,)), ((), ())),
                               preferred_element_type=jnp.float32)

    u = _normalize(u)
    v = jnp.zeros((1, W.shape[1]), jnp.float32)

    def body(_, carry):
        u, v = carry
        v = _normalize(_uW(u))
        u = _normalize(_vWt(v))
        return (u, v)

    u, v = lax.fori_loop(0, n_spectral_iter, body, (u, v), unroll=True)

    sigma = jnp.sum(u * _vWt(v))                              # u^T W v
    sigma = jnp.maximum(sigma, jnp.float32(EPS))              # guard /0 (iter==0, zero W)
    scale_ref[0, 0] = jnp.minimum(jnp.float32(1.0), jnp.float32(coeff) / sigma)


# --------------------------------------------------------------------------
# Stage 2: tiled GEMM,  y = scale * (x @ W^T) + b
# --------------------------------------------------------------------------
def _gemm_kernel(scale_ref, x_ref, w_ref, b_ref, y_ref, acc_ref):
    k = pl.program_id(2)

    @pl.when(k == 0)
    def _():
        acc_ref[...] = jnp.zeros_like(acc_ref)

    # contract on the stored `in` axis of both x (tm,tk) and W (tn,tk): no .T
    acc_ref[...] += lax.dot_general(
        x_ref[...], w_ref[...],
        dimension_numbers=(((1,), (1,)), ((), ())),
        preferred_element_type=jnp.float32)

    @pl.when(k == pl.num_programs(2) - 1)
    def _():
        scale = scale_ref[0, 0]                                # SMEM scalar
        y = scale * acc_ref[...] + b_ref[...].astype(jnp.float32)
        y_ref[...] = y.astype(y_ref.dtype)


# --------------------------------------------------------------------------
# Wrapper
# --------------------------------------------------------------------------
def _round_up(a, m):
    return ((a + m - 1) // m) * m


def _pad_cast_2d(a, rows, cols, dtype):
    """Cast to `dtype` and zero-pad to (rows, cols); complete no-op when aligned."""
    if a.dtype != dtype:
        a = a.astype(dtype)
    if a.shape != (rows, cols):
        a = jnp.zeros((rows, cols), dtype).at[:a.shape[0], :a.shape[1]].set(a)
    return a


def linear_constrained(x, weight, bias, u0, *, coeff, n_spectral_iter,
                       tm=256, tn=512, tk=512, use_bf16_matmul=True):
    """x: (B, in), weight: (out, in), bias: (out,), u0: (out, 1) -> (B, out)."""
    B, K = x.shape
    N = weight.shape[0]

    mm_dtype = jnp.bfloat16 if use_bf16_matmul else jnp.float32
    in_bytes = 2 if use_bf16_matmul else 4
    out_dtype = x.dtype
    out_bytes = x.dtype.itemsize

    # ---- tile selection ---------------------------------------------------
    # bf16 packs 2 rows / sublane: keep tm a multiple of 16 on the bf16 path.
    align_m = 16 if use_bf16_matmul else 8
    tm = min(tm, _round_up(B, align_m))
    tn = min(tn, _round_up(N, 128))
    tk = min(tk, _round_up(K, 128))

    # Keep the double-buffered working set under the v5e default scoped VMEM.
    def _tile_bytes(tm_, tn_, tk_):
        return (2 * (tm_ * tk_ + tn_ * tk_) * in_bytes   # x / W double-buffered
                + 2 * tm_ * tn_ * out_bytes              # y double-buffered
                + tm_ * tn_ * 4                          # f32 accumulator
                + 2 * tn_ * 4)                           # bias
    budget = 12 << 20
    while _tile_bytes(tm, tn, tk) > budget and tk > 128:
        tk = max(128, (tk // 2) // 128 * 128)
    while _tile_bytes(tm, tn, tk) > budget and tn > 128:
        tn = max(128, (tn // 2) // 128 * 128)

    Mp, Np, Kp = _round_up(B, tm), _round_up(N, tn), _round_up(K, tk)

    # v7x shards "parallel" grid axes across 2 TensorCores: make sure there are
    # at least 2 parallel tiles whenever the problem is large enough to split.
    while (Mp // tm) * (Np // tn) < 2 and tn > 128:
        tn = max(128, (tn // 2) // 128 * 128)
        Np = _round_up(N, tn)

    # ---- pad directly in the matmul dtype (skipped entirely when aligned) --
    x_mm = _pad_cast_2d(x, Mp, Kp, mm_dtype)
    w_mm = _pad_cast_2d(weight, Np, Kp, mm_dtype)
    b_p = _pad_cast_2d(bias.reshape(1, -1), 1, Np, jnp.float32)
    u0_p = _pad_cast_2d(u0.reshape(1, -1), 1, Np, jnp.float32)

    # ---- stage 1: scale (whole padded W resident in VMEM, scalar out in SMEM)
    # TODO(synk): for W larger than ~60 MiB even in bf16 (v7x has 64 MiB VMEM
    # per TensorCore), restructure stage 1 as a tiled power iteration
    # (emit_pipeline over N-tiles with a (1,Kp) v accumulator).
    w_vmem_bytes = Np * Kp * in_bytes
    stage1_vmem = int(min(max(w_vmem_bytes + (4 << 20), 16 << 20), 64 << 20))
    scale = pl.pallas_call(
        functools.partial(_scale_kernel,
                          n_spectral_iter=n_spectral_iter, coeff=coeff),
        out_shape=jax.ShapeDtypeStruct((1, 1), jnp.float32),
        in_specs=[pl.BlockSpec(memory_space=pltpu.MemorySpace.VMEM),
                  pl.BlockSpec(memory_space=pltpu.MemorySpace.VMEM)],
        out_specs=pl.BlockSpec(memory_space=pltpu.MemorySpace.SMEM),
        compiler_params=pltpu.CompilerParams(vmem_limit_bytes=stage1_vmem),
    )(w_mm, u0_p)

    # ---- stage 2: tiled, pipelined GEMM -------------------------------------
    grid = (Mp // tm, Np // tn, Kp // tk)

    # Deeper buffering on the x/W streams hides DMA latency when the K loop is
    # bandwidth-bound (small batch, many K tiles).
    if (Mp // tm) == 1 and (Kp // tk) >= 2:
        x_spec = pl.BlockSpec((tm, tk), lambda i, j, k: (i, k),
                              pipeline_mode=pl.Buffered(3))
        w_spec = pl.BlockSpec((tn, tk), lambda i, j, k: (j, k),
                              pipeline_mode=pl.Buffered(3))
    else:
        x_spec = pl.BlockSpec((tm, tk), lambda i, j, k: (i, k))
        w_spec = pl.BlockSpec((tn, tk), lambda i, j, k: (j, k))

    cost = pl.CostEstimate(
        flops=2 * Mp * Np * Kp,
        transcendentals=0,
        bytes_accessed=(Mp * Kp + Np * Kp) * in_bytes + Mp * Np * out_bytes + Np * 4)

    y_p = pl.pallas_call(
        _gemm_kernel,
        out_shape=jax.ShapeDtypeStruct((Mp, Np), out_dtype),
        grid=grid,
        in_specs=[
            pl.BlockSpec(memory_space=pltpu.MemorySpace.SMEM),   # scale (1,1)
            x_spec,                                              # x (tm,tk)
            w_spec,                                              # W (tn,tk), stored (out,in)
            pl.BlockSpec((1, tn), lambda i, j, k: (0, j)),       # bias
        ],
        out_specs=pl.BlockSpec((tm, tn), lambda i, j, k: (i, j)),
        scratch_shapes=[pltpu.VMEM((tm, tn), jnp.float32)],
        compiler_params=pltpu.CompilerParams(
            dimension_semantics=("parallel", "parallel", "arbitrary")),
        cost_estimate=cost,
    )(scale, x_mm, w_mm, b_p)

    return y_p[:B, :N]


# --------------------------------------------------------------------------
# Pure-jnp reference mirroring the PyTorch forward (real-weight path)
# --------------------------------------------------------------------------
def _reference(x, weight, bias, u0, *, coeff, n_spectral_iter):
    def normalize(z):
        return z / jnp.maximum(jnp.linalg.norm(z), EPS)
    u = normalize(u0)
    v = None
    for _ in range(n_spectral_iter):
        v = normalize(weight.T @ u)
        u = normalize(weight @ v)
    sigma = jnp.sum(u.T @ weight @ v)
    scale = jnp.minimum(1.0, coeff / sigma)
    return x @ (scale * weight).T + bias


if __name__ == "__main__":
    key = jax.random.PRNGKey(0)
    k_x, k_w, k_b, k_u = jax.random.split(key, 4)

    batch, input_dim, output_dim = 8, 32, 32
    coeff = 0.9
    n_spectral_iter = 5  # iterative_step_manager.get_config()['n_spectral_iter']

    # Deterministic parameter init (module keeps float32; the Rayleigh complex
    # init is cast straight back to float32, so a real Gaussian-scale init is
    # semantically equivalent here).
    # TODO(synk): true complex-weight path (conjugate transposes) not implemented;
    # the float32 module configuration is fully covered.
    fan_in = input_dim
    sigma_init = 1.0 / jnp.sqrt(jnp.float32(fan_in + output_dim))
    weight = sigma_init * jax.random.normal(k_w, (output_dim, input_dim), jnp.float32)
    bound = 1.0 / jnp.sqrt(jnp.float32(fan_in))
    bias = jax.random.uniform(k_b, (output_dim,), jnp.float32, -bound, bound)
    # deterministic replacement for torch.rand power-iteration start vector
    u0 = jax.random.uniform(k_u, (output_dim, 1), jnp.float32)

    x = jax.random.normal(k_x, (batch, input_dim), jnp.float32)

    y_ref = _reference(x, weight, bias, u0,
                       coeff=coeff, n_spectral_iter=n_spectral_iter)

    # Exact path (f32 MXU operands): strict tolerance.
    y_f32 = jax.block_until_ready(
        linear_constrained(x, weight, bias, u0, coeff=coeff,
                           n_spectral_iter=n_spectral_iter,
                           use_bf16_matmul=False))
    assert jnp.allclose(y_f32, y_ref, atol=1e-5, rtol=1e-5), "f32 path mismatch"

    # Default path (bf16 MXU operands, f32 accumulate): bf16-level tolerance.
    # Note: sigma is estimated from the bf16-rounded W, so the Lipschitz bound
    # can be exceeded by ~1e-3 relative — fine for training.
    y_bf16 = jax.block_until_ready(
        linear_constrained(x, weight, bias, u0, coeff=coeff,
                           n_spectral_iter=n_spectral_iter))
    assert jnp.allclose(y_bf16, y_ref, atol=3e-2, rtol=3e-2), "bf16 path mismatch"

    print("KERNEL_OK")
</pallas_src>

<mosaic_0001>
module attributes {stable_mosaic.version = 11 : i64} {
  func.func @_scale_kernel(%arg0: memref<128x128xf32, #tpu.memory_space<vmem>>, %arg1: memref<1x128xf32, #tpu.memory_space<vmem>>, %arg2: memref<1x1xf32, #tpu.memory_space<smem>>) attributes {dimension_semantics = [], scalar_prefetch = 0 : i64, scratch_operands = 0 : i64, tpu.core_type = #tpu.core_type<tc>} {
    %c0 = arith.constant 0 : index
    %c0_0 = arith.constant 0 : index
    %0 = vector.load %arg0[%c0, %c0_0] : memref<128x128xf32, #tpu.memory_space<vmem>>, vector<128x128xf32>
    %c0_1 = arith.constant 0 : index
    %c0_2 = arith.constant 0 : index
    %1 = vector.load %arg1[%c0_1, %c0_2] : memref<1x128xf32, #tpu.memory_space<vmem>>, vector<1x128xf32>
    %2 = arith.mulf %1, %1 : vector<1x128xf32>
    %3 = vector.shape_cast %2 : vector<1x128xf32> to vector<1x1x128xf32>
    %cst = arith.constant dense<0.000000e+00> : vector<1xf32>
    %4 = vector.multi_reduction <add>, %3, %cst [1, 2] : vector<1x1x128xf32> to vector<1xf32>
    %5 = vector.shape_cast %4 : vector<1xf32> to vector<1x1x1xf32>
    %6 = vector.extract %5[0, 0, 0] : f32 from vector<1x1x1xf32>
    %cst_3 = arith.constant 1.000000e-24 : f32
    %7 = arith.maximumf %6, %cst_3 : f32
    %8 = math.rsqrt %7 : f32
    %9 = vector.broadcast %8 : f32 to vector<1x128xf32>
    %10 = arith.mulf %1, %9 : vector<1x128xf32>
    %cst_4 = arith.constant 0.000000e+00 : f32
    %11 = vector.broadcast %cst_4 : f32 to vector<1x128xf32>
    %c0_i32 = arith.constant 0 : i32
    %cst_5 = arith.constant dense<0.000000e+00> : vector<1x128xf32>
    %12 = tpu.matmul %10, %0, %cst_5 {dimension_numbers = #tpu.dot_dimension_numbers<[1], [0], [0], [1], [0, 0, 1, 1], [], []>} : vector<1x128xf32>, vector<128x128xf32>, vector<1x128xf32> -> vector<1x128xf32>
    %13 = arith.mulf %12, %12 : vector<1x128xf32>
    %14 = vector.shape_cast %13 : vector<1x128xf32> to vector<1x1x128xf32>
    %cst_6 = arith.constant dense<0.000000e+00> : vector<1xf32>
    %15 = vector.multi_reduction <add>, %14, %cst_6 [1, 2] : vector<1x1x128xf32> to vector<1xf32>
    %16 = vector.shape_cast %15 : vector<1xf32> to vector<1x1x1xf32>
    %17 = vector.extract %16[0, 0, 0] : f32 from vector<1x1x1xf32>
    %cst_7 = arith.constant 1.000000e-24 : f32
    %18 = arith.maximumf %17, %cst_7 : f32
    %19 = math.rsqrt %18 : f32
    %20 = vector.broadcast %19 : f32 to vector<1x128xf32>
    %21 = arith.mulf %12, %20 : vector<1x128xf32>
    %cst_8 = arith.constant dense<0.000000e+00> : vector<1x128xf32>
    %22 = tpu.matmul %21, %0, %cst_8 {dimension_numbers = #tpu.dot_dimension_numbers<[1], [1], [0], [0], [0, 0, 1, 0], [], []>} : vector<1x128xf32>, vector<128x128xf32>, vector<1x128xf32> -> vector<1x128xf32>
    %23 = arith.mulf %22, %22 : vector<1x128xf32>
    %24 = vector.shape_cast %23 : vector<1x128xf32> to vector<1x1x128xf32>
    %cst_9 = arith.constant dense<0.000000e+00> : vector<1xf32>
    %25 = vector.multi_reduction <add>, %24, %cst_9 [1, 2] : vector<1x1x128xf32> to vector<1xf32>
    %26 = vector.shape_cast %25 : vector<1xf32> to vector<1x1x1xf32>
    %27 = vector.extract %26[0, 0, 0] : f32 from vector<1x1x1xf32>
    %cst_10 = arith.constant 1.000000e-24 : f32
    %28 = arith.maximumf %27, %cst_10 : f32
    %29 = math.rsqrt %28 : f32
    %30 = vector.broadcast %29 : f32 to vector<1x128xf32>
    %31 = arith.mulf %22, %30 : vector<1x128xf32>
    %c1_i32 = arith.constant 1 : i32
    %cst_11 = arith.constant dense<0.000000e+00> : vector<1x128xf32>
    %32 = tpu.matmul %31, %0, %cst_11 {dimension_numbers = #tpu.dot_dimension_numbers<[1], [0], [0], [1], [0, 0, 1, 1], [], []>} : vector<1x128xf32>, vector<128x128xf32>, vector<1x128xf32> -> vector<1x128xf32>
    %33 = arith.mulf %32, %32 : vector<1x128xf32>
    %34 = vector.shape_cast %33 : vector<1x128xf32> to vector<1x1x128xf32>
    %cst_12 = arith.constant dense<0.000000e+00> : vector<1xf32>
    %35 = vector.multi_reduction <add>, %34, %cst_12 [1, 2] : vector<1x1x128xf32> to vector<1xf32>
    %36 = vector.shape_cast %35 : vector<1xf32> to vector<1x1x1xf32>
    %37 = vector.extract %36[0, 0, 0] : f32 from vector<1x1x1xf32>
    %cst_13 = arith.constant 1.000000e-24 : f32
    %38 = arith.maximumf %37, %cst_13 : f32
    %39 = math.rsqrt %38 : f32
    %40 = vector.broadcast %39 : f32 to vector<1x128xf32>
    %41 = arith.mulf %32, %40 : vector<1x128xf32>
    %cst_14 = arith.constant dense<0.000000e+00> : vector<1x128xf32>
    %42 = tpu.matmul %41, %0, %cst_14 {dimension_numbers = #tpu.dot_dimension_numbers<[1], [1], [0], [0], [0, 0, 1, 0], [], []>} : vector<1x128xf32>, vector<128x128xf32>, vector<1x128xf32> -> vector<1x128xf32>
    %43 = arith.mulf %42, %42 : vector<1x128xf32>
    %44 = vector.shape_cast %43 : vector<1x128xf32> to vector<1x1x128xf32>
    %cst_15 = arith.constant dense<0.000000e+00> : vector<1xf32>
    %45 = vector.multi_reduction <add>, %44, %cst_15 [1, 2] : vector<1x1x128xf32> to vector<1xf32>
    %46 = vector.shape_cast %45 : vector<1xf32> to vector<1x1x1xf32>
    %47 = vector.extract %46[0, 0, 0] : f32 from vector<1x1x1xf32>
    %cst_16 = arith.constant 1.000000e-24 : f32
    %48 = arith.maximumf %47, %cst_16 : f32
    %49 = math.rsqrt %48 : f32
    %50 = vector.broadcast %49 : f32 to vector<1x128xf32>
    %51 = arith.mulf %42, %50 : vector<1x128xf32>
    %c2_i32 = arith.constant 2 : i32
    %cst_17 = arith.constant dense<0.000000e+00> : vector<1x128xf32>
    %52 = tpu.matmul %51, %0, %cst_17 {dimension_numbers = #tpu.dot_dimension_numbers<[1], [0], [0], [1], [0, 0, 1, 1], [], []>} : vector<1x128xf32>, vector<128x128xf32>, vector<1x128xf32> -> vector<1x128xf32>
    %53 = arith.mulf %52, %52 : vector<1x128xf32>
    %54 = vector.shape_cast %53 : vector<1x128xf32> to vector<1x1x128xf32>
    %cst_18 = arith.constant dense<0.000000e+00> : vector<1xf32>
    %55 = vector.multi_reduction <add>, %54, %cst_18 [1, 2] : vector<1x1x128xf32> to vector<1xf32>
    %56 = vector.shape_cast %55 : vector<1xf32> to vector<1x1x1xf32>
    %57 = vector.extract %56[0, 0, 0] : f32 from vector<1x1x1xf32>
    %cst_19 = arith.constant 1.000000e-24 : f32
    %58 = arith.maximumf %57, %cst_19 : f32
    %59 = math.rsqrt %58 : f32
    %60 = vector.broadcast %59 : f32 to vector<1x128xf32>
    %61 = arith.mulf %52, %60 : vector<1x128xf32>
    %cst_20 = arith.constant dense<0.000000e+00> : vector<1x128xf32>
    %62 = tpu.matmul %61, %0, %cst_20 {dimension_numbers = #tpu.dot_dimension_numbers<[1], [1], [0], [0], [0, 0, 1, 0], [], []>} : vector<1x128xf32>, vector<128x128xf32>, vector<1x128xf32> -> vector<1x128xf32>
    %63 = arith.mulf %62, %62 : vector<1x128xf32>
    %64 = vector.shape_cast %63 : vector<1x128xf32> to vector<1x1x128xf32>
    %cst_21 = arith.constant dense<0.000000e+00> : vector<1xf32>
    %65 = vector.multi_reduction <add>, %64, %cst_21 [1, 2] : vector<1x1x128xf32> to vector<1xf32>
    %66 = vector.shape_cast %65 : vector<1xf32> to vector<1x1x1xf32>
    %67 = vector.extract %66[0, 0, 0] : f32 from vector<1x1x1xf32>
    %cst_22 = arith.constant 1.000000e-24 : f32
    %68 = arith.maximumf %67, %cst_22 : f32
    %69 = math.rsqrt %68 : f32
    %70 = vector.broadcast %69 : f32 to vector<1x128xf32>
    %71 = arith.mulf %62, %70 : vector<1x128xf32>
    %c3_i32 = arith.constant 3 : i32
    %cst_23 = arith.constant dense<0.000000e+00> : vector<1x128xf32>
    %72 = tpu.matmul %71, %0, %cst_23 {dimension_numbers = #tpu.dot_dimension_numbers<[1], [0], [0], [1], [0, 0, 1, 1], [], []>} : vector<1x128xf32>, vector<128x128xf32>, vector<1x128xf32> -> vector<1x128xf32>
    %73 = arith.mulf %72, %72 : vector<1x128xf32>
    %74 = vector.shape_cast %73 : vector<1x128xf32> to vector<1x1x128xf32>
    %cst_24 = arith.constant dense<0.000000e+00> : vector<1xf32>
    %75 = vector.multi_reduction <add>, %74, %cst_24 [1, 2] : vector<1x1x128xf32> to vector<1xf32>
    %76 = vector.shape_cast %75 : vector<1xf32> to vector<1x1x1xf32>
    %77 = vector.extract %76[0, 0, 0] : f32 from vector<1x1x1xf32>
    %cst_25 = arith.constant 1.000000e-24 : f32
    %78 = arith.maximumf %77, %cst_25 : f32
    %79 = math.rsqrt %78 : f32
    %80 = vector.broadcast %79 : f32 to vector<1x128xf32>
    %81 = arith.mulf %72, %80 : vector<1x128xf32>
    %cst_26 = arith.constant dense<0.000000e+00> : vector<1x128xf32>
    %82 = tpu.matmul %81, %0, %cst_26 {dimension_numbers = #tpu.dot_dimension_numbers<[1], [1], [0], [0], [0, 0, 1, 0], [], []>} : vector<1x128xf32>, vector<128x128xf32>, vector<1x128xf32> -> vector<1x128xf32>
    %83 = arith.mulf %82, %82 : vector<1x128xf32>
    %84 = vector.shape_cast %83 : vector<1x128xf32> to vector<1x1x128xf32>
    %cst_27 = arith.constant dense<0.000000e+00> : vector<1xf32>
    %85 = vector.multi_reduction <add>, %84, %cst_27 [1, 2] : vector<1x1x128xf32> to vector<1xf32>
    %86 = vector.shape_cast %85 : vector<1xf32> to vector<1x1x1xf32>
    %87 = vector.extract %86[0, 0, 0] : f32 from vector<1x1x1xf32>
    %cst_28 = arith.constant 1.000000e-24 : f32
    %88 = arith.maximumf %87, %cst_28 : f32
    %89 = math.rsqrt %88 : f32
    %90 = vector.broadcast %89 : f32 to vector<1x128xf32>
    %91 = arith.mulf %82, %90 : vector<1x128xf32>
    %c4_i32 = arith.constant 4 : i32
    %cst_29 = arith.constant dense<0.000000e+00> : vector<1x128xf32>
    %92 = tpu.matmul %91, %0, %cst_29 {dimension_numbers = #tpu.dot_dimension_numbers<[1], [0], [0], [1], [0, 0, 1, 1], [], []>} : vector<1x128xf32>, vector<128x128xf32>, vector<1x128xf32> -> vector<1x128xf32>
    %93 = arith.mulf %92, %92 : vector<1x128xf32>
    %94 = vector.shape_cast %93 : vector<1x128xf32> to vector<1x1x128xf32>
    %cst_30 = arith.constant dense<0.000000e+00> : vector<1xf32>
    %95 = vector.multi_reduction <add>, %94, %cst_30 [1, 2] : vector<1x1x128xf32> to vector<1xf32>
    %96 = vector.shape_cast %95 : vector<1xf32> to vector<1x1x1xf32>
    %97 = vector.extract %96[0, 0, 0] : f32 from vector<1x1x1xf32>
    %cst_31 = arith.constant 1.000000e-24 : f32
    %98 = arith.maximumf %97, %cst_31 : f32
    %99 = math.rsqrt %98 : f32
    %100 = vector.broadcast %99 : f32 to vector<1x128xf32>
    %101 = arith.mulf %92, %100 : vector<1x128xf32>
    %cst_32 = arith.constant dense<0.000000e+00> : vector<1x128xf32>
    %102 = tpu.matmul %101, %0, %cst_32 {dimension_numbers = #tpu.dot_dimension_numbers<[1], [1], [0], [0], [0, 0, 1, 0], [], []>} : vector<1x128xf32>, vector<128x128xf32>, vector<1x128xf32> -> vector<1x128xf32>
    %103 = arith.mulf %102, %102 : vector<1x128xf32>
    %104 = vector.shape_cast %103 : vector<1x128xf32> to vector<1x1x128xf32>
    %cst_33 = arith.constant dense<0.000000e+00> : vector<1xf32>
    %105 = vector.multi_reduction <add>, %104, %cst_33 [1, 2] : vector<1x1x128xf32> to vector<1xf32>
    %106 = vector.shape_cast %105 : vector<1xf32> to vector<1x1x1xf32>
    %107 = vector.extract %106[0, 0, 0] : f32 from vector<1x1x1xf32>
    %cst_34 = arith.constant 1.000000e-24 : f32
    %108 = arith.maximumf %107, %cst_34 : f32
    %109 = math.rsqrt %108 : f32
    %110 = vector.broadcast %109 : f32 to vector<1x128xf32>
    %111 = arith.mulf %102, %110 : vector<1x128xf32>
    %cst_35 = arith.constant dense<0.000000e+00> : vector<1x128xf32>
    %112 = tpu.matmul %101, %0, %cst_35 {dimension_numbers = #tpu.dot_dimension_numbers<[1], [1], [0], [0], [0, 0, 1, 0], [], []>} : vector<1x128xf32>, vector<128x128xf32>, vector<1x128xf32> -> vector<1x128xf32>
    %113 = arith.mulf %111, %112 : vector<1x128xf32>
    %114 = vector.shape_cast %113 : vector<1x128xf32> to vector<1x1x128xf32>
    %cst_36 = arith.constant dense<0.000000e+00> : vector<1xf32>
    %115 = vector.multi_reduction <add>, %114, %cst_36 [1, 2] : vector<1x1x128xf32> to vector<1xf32>
    %116 = vector.shape_cast %115 : vector<1xf32> to vector<1x1x1xf32>
    %117 = vector.extract %116[0, 0, 0] : f32 from vector<1x1x1xf32>
    %cst_37 = arith.constant 9.99999996E-13 : f32
    %118 = arith.maximumf %117, %cst_37 : f32
    %cst_38 = arith.constant 0.899999976 : f32
    %119 = arith.divf %cst_38, %118 : f32
    %cst_39 = arith.constant 1.000000e+00 : f32
    %120 = arith.minimumf %cst_39, %119 : f32
    %c0_40 = arith.constant 0 : index
    %c0_41 = arith.constant 0 : index
    %121 = memref.load %arg2[%c0_40, %c0_41] : memref<1x1xf32, #tpu.memory_space<smem>>
    memref.store %120, %arg2[%c0_40, %c0_41] : memref<1x1xf32, #tpu.memory_space<smem>>
    return
  }
}

</mosaic_0001>

<bundles_post_ra>
// kernel: tpu_custom_call.1
= control target key start
LH: loop header
LB: loop body
LE: loop exit
PB: predicated region body
PF: predicated region fallthrough
CT: control target
= control target key end

     0   :  { %7 = vsyncpa [#allocation3], 0  ;;  %s2118_s0 = inlined_call_operand.hbm [shape: f32[128,128], index: 0, kind: input, shape index: {}]   ;;  %s2119_s1 = inlined_call_operand.vmem [shape: f32[1,128], index: 1, kind: input, shape index: {}]   ;;  %s2120_s2 = inlined_call_operand.hbm [shape: f32[1,1], index: 2, kind: output, shape index: {}]  }
   0x1   :  { %8 = vsyncpa [#allocation4], 0  ;;  %s1842_s9 = smov [#allocation2]   ;;  %s1806_s13 = scalar_lea.hbm %s2118_s0, 2048 }
   0x2   :  { %s14_s10 = sshll.u32 %s1842_s9, 4  ;;  %p1807_p0 = scmp.ne.s32.totalorder %s2118_s0, %s1806_s13  ;;  %s15_s10 = int_to_ptr.vmem [resolvable:$true] %s14_s10 }
   0x3   :  { %p1810_p1 = scmp.lt.u32.totalorder %s1806_s13, %s2118_s0 }
   0x5   :  { %p1812_p2 = pnand %p1810_p1, %p1807_p0 }
   0x7   :  { %1815 = shalt.err (!%p1812_p2)
}
   0x8   :  { %s1816_s18 = scalar_lea.vmem %s15_s10, 2048  ;;  %p1821_p4 = scmp.lt.s32.totalorder %s15_s10, %s15_s10 }
   0x9   :  { %p1817_p3 = scmp.ne.s32.totalorder %s15_s10, %s1816_s18  ;;  %p1822_p5 = scmp.lt.s32.totalorder %s1816_s18, %s1816_s18 }
   0xb   :  { %p1823_p6 = por %p1822_p5, %p1821_p4 }
   0xd   :  { %p1824_p7 = pnand %p1823_p6, %p1817_p3 }
   0xf   :  { %1827 = shalt.err (!%p1824_p7)
}
  0x10   :  { %s1843_s19 = smov 128   ;;  %s1844_s20 = smov 8  }
  0x11   :  { %20 = dma.hbm_to_vmem [thread:$0]  %s2118_s0, 2048, %s15_s10, [#allocation3], %s1843_s19, %s1843_s19, %s1844_s20  }
  0x12   :  { %1838 = dma.done.wait [#allocation3], 2048  }
  0x13   :  { %1839 = vsyncadd [#allocation3], 4294965248  ;;  %v1882_v0 = vld [vmem:[%s2119_s1] sm:$0x1]  ;;  %vm44_vm0 = vcmask 1040384   ;;  %v27_v4 = vld [vmem:[#allocation2 + $0x8] sm:$0xff] }
  0x14   :  { %v43_v1 = vmul.f32 %v1882_v0, %v1882_v0  ;;  %v26_v3 = vld [vmem:[#allocation2] sm:$0xff]  ;;  %v28_v5 = vld [vmem:[#allocation2 + $0x10] sm:$0xff]  ;;  %v1845_v6 = vmov 0.0|0.0   ;;  %v29_v8 = vld [vmem:[#allocation2 + $0x18] sm:$0xff]  ;;  %vm1846_vm1 = vmmov 0   ;;  %v1847_v29 = vmov 0.0  }
  0x15   :  { %1484 = vmatprep.subr.bf16.mxu0 %v1845_v6  ;;  %v1888_v7 = vpack.c.bf16 %v27_v4, %v26_v3  ;;  %1508 = vmatprep.subr.bf16.mxu1 %v1845_v6  ;;  %v1892_v9 = vpack.c.bf16 %v29_v8, %v28_v5  ;;  %v30_v10 = vld [vmem:[#allocation2 + $0x20] sm:$0xff]  ;;  %v31_v11 = vld [vmem:[#allocation2 + $0x28] sm:$0xff]  ;;  %v32_v13 = vld [vmem:[#allocation2 + $0x30] sm:$0xff]  ;;  %s1848_s1 = smov 1e-24  }
  0x16   :  { %v45_v2 = vsel %vm44_vm0, %v43_v1, 0.0  ;;  %v1898_v12 = vpack.c.bf16 %v31_v11, %v30_v10  ;;  %v33_v14 = vld [vmem:[#allocation2 + $0x38] sm:$0xff]  ;;  %v34_v16 = vld [vmem:[#allocation2 + $0x40] sm:$0xff]  ;;  %v35_v17 = vld [vmem:[#allocation2 + $0x48] sm:$0xff]  ;;  %1166 = vmatprep.mubr.msk.f32.mxu0 %vm1846_vm1, %v1847_v29  ;;  %1201 = vmatprep.mubr.msk.f32.mxu1 %vm1846_vm1, %v1847_v29 }
  0x17   :  { %46 = vadd.xlane.f32.xlu0 %v45_v2  ;;  %1486 = vmatpush3.bf16.msra.mxu0 %v1888_v7  ;;  %v1902_v15 = vpack.c.bf16 %v33_v14, %v32_v13  ;;  %v1908_v18 = vpack.c.bf16 %v35_v17, %v34_v16  ;;  %v36_v19 = vld [vmem:[#allocation2 + $0x50] sm:$0xff]  ;;  %v37_v20 = vld [vmem:[#allocation2 + $0x58] sm:$0xff]  ;;  %v38_v22 = vld [vmem:[#allocation2 + $0x60] sm:$0xff] }
  0x18   :  { %1510 = vmatpush3.bf16.xpose.msra.mxu1 %v1888_v7  ;;  %1487 = vmatprep.subr.bf16.mxu0 %v1845_v6  ;;  %v1912_v21 = vpack.c.bf16 %v37_v20, %v36_v19  ;;  %v39_v23 = vld [vmem:[#allocation2 + $0x68] sm:$0xff]  ;;  %v40_v25 = vld [vmem:[#allocation2 + $0x70] sm:$0xff]  ;;  %v41_v26 = vld [vmem:[#allocation2 + $0x78] sm:$0xff] }
  0x19   :  { %1511 = vmatprep.subr.bf16.mxu1 %v1845_v6  ;;  %v1918_v24 = vpack.c.bf16 %v39_v23, %v38_v22  ;;  %v1929_v27 = vpack.c.bf16 %v41_v26, %v40_v25 }
  0x1b   :  { %1489 = vmatpush3.bf16.msra.mxu0 %v1892_v9 }
  0x1c   :  { %1490 = vmatprep.subr.bf16.mxu0 %v1845_v6 }
  0x1f   :  { %1492 = vmatpush3.bf16.msra.mxu0 %v1898_v12 }
  0x20   :  { %1513 = vmatpush3.bf16.xpose.msra.mxu1 %v1892_v9  ;;  %1493 = vmatprep.subr.bf16.mxu0 %v1845_v6 }
  0x21   :  { %1514 = vmatprep.subr.bf16.mxu1 %v1845_v6 }
  0x23   :  { %1495 = vmatpush3.bf16.msra.mxu0 %v1902_v15 }
  0x24   :  { %1496 = vmatprep.subr.bf16.mxu0 %v1845_v6 }
  0x27   :  { %1498 = vmatpush3.bf16.msra.mxu0 %v1908_v18 }
  0x28   :  { %1516 = vmatpush3.bf16.xpose.msra.mxu1 %v1898_v12  ;;  %1499 = vmatprep.subr.bf16.mxu0 %v1845_v6 }
  0x29   :  { %1517 = vmatprep.subr.bf16.mxu1 %v1845_v6 }
  0x2b   :  { %1501 = vmatpush3.bf16.msra.mxu0 %v1912_v21 }
  0x2c   :  { %1502 = vmatprep.subr.bf16.mxu0 %v1845_v6 }
  0x2f   :  { %1504 = vmatpush3.bf16.msra.mxu0 %v1918_v24 }
  0x30   :  { %1519 = vmatpush3.bf16.xpose.msra.mxu1 %v1902_v15  ;;  %1505 = vmatprep.subr.bf16.mxu0 %v1845_v6 }
  0x31   :  { %1520 = vmatprep.subr.bf16.mxu1 %v1845_v6 }
  0x33   :  { %1507 = vmatpush3.bf16.msra.mxu0 %v1929_v27 }
  0x34   :  { %1532 = vmatprep.subr.bf16.mxu0 %v1845_v6 }
  0x38   :  { %1522 = vmatpush3.bf16.xpose.msra.mxu1 %v1908_v18 }
  0x39   :  { %1523 = vmatprep.subr.bf16.mxu1 %v1845_v6 }
  0x40   :  { %1525 = vmatpush3.bf16.xpose.msra.mxu1 %v1912_v21 }
  0x41   :  { %1526 = vmatprep.subr.bf16.mxu1 %v1845_v6 }
  0x48   :  { %1528 = vmatpush3.bf16.xpose.msra.mxu1 %v1918_v24 }
  0x49   :  { %1529 = vmatprep.subr.bf16.mxu1 %v1845_v6 }
  0x50   :  { %1531 = vmatpush3.bf16.xpose.msra.mxu1 %v1929_v27 }
  0x51   :  { %1580 = vmatprep.subr.bf16.mxu1 %v1845_v6 }
  0xa4   :  { %v47_v28 = vpop.xlane.xlu0 %46 }
  0xa5   :  { %v48_v30 = vrot.slane %v47_v28, 4 }
  0xa7   :  { %v49_v31 = vadd.f32 %v48_v30, %v47_v28 }
  0xa9   :  { %v50_v32 = vrot.slane %v49_v31, 2 }
  0xab   :  { %v51_v33 = vadd.f32 %v50_v32, %v49_v31 }
  0xad   :  { %v52_v34 = vrot.slane %v51_v33, 1 }
  0xaf   :  { %v53_v35 = vadd.f32 %v52_v34, %v51_v33 }
  0xb1   :  { %1724 = vpush %v53_v35 }
  0xe2   :  { %s1725_s0 = spop %1724 }
  0xe3   :  { %s55_s25 = smax.f32 %s1848_s1, %s1725_s0 }
  0xe4   :  { %v56_v36 = vstv %s55_s25 }
  0xe5   :  { %1782 = vrsqrt.f32 %v56_v36 }
  0xef   :  { %v1783_v37 = vpop.eup %1782 }
  0xf0   :  { %1726 = vpush %v1783_v37 }
 0x121   :  { %s1727_s26 = spop %1726 }
 0x122   :  { %v59_v38 = vstv %s1727_s26 }
 0x123   :  { %v60_v39 = vmul.f32 %v59_v38, %v1882_v0 }
 0x125   :  { %1167 = vmatmul.mubr.f32.vlgmr.msra.gmra.mrb[0].mxu0 %v60_v39 }
 0x126   :  { %1534 = vmatpush3.bf16.msra.mxu0 %v1888_v7  ;;  %1236 = vmatprep.mubr.msk.f32.mxu0 %vm1846_vm1, %v1847_v29 }
 0x127   :  { %1535 = vmatprep.subr.bf16.mxu0 %v1845_v6 }
 0x12a   :  { %1537 = vmatpush3.bf16.msra.mxu0 %v1892_v9 }
 0x12b   :  { %1538 = vmatprep.subr.bf16.mxu0 %v1845_v6 }
 0x12e   :  { %1540 = vmatpush3.bf16.msra.mxu0 %v1898_v12 }
 0x12f   :  { %1541 = vmatprep.subr.bf16.mxu0 %v1845_v6 }
 0x132   :  { %1543 = vmatpush3.bf16.msra.mxu0 %v1902_v15 }
 0x133   :  { %1544 = vmatprep.subr.bf16.mxu0 %v1845_v6 }
 0x136   :  { %1546 = vmatpush3.bf16.msra.mxu0 %v1908_v18 }
 0x137   :  { %1547 = vmatprep.subr.bf16.mxu0 %v1845_v6 }
 0x13a   :  { %1549 = vmatpush3.bf16.msra.mxu0 %v1912_v21 }
 0x13b   :  { %1550 = vmatprep.subr.bf16.mxu0 %v1845_v6 }
 0x13e   :  { %1552 = vmatpush3.bf16.msra.mxu0 %v1918_v24 }
 0x13f   :  { %1553 = vmatprep.subr.bf16.mxu0 %v1845_v6 }
 0x142   :  { %1555 = vmatpush3.bf16.msra.mxu0 %v1929_v27 }
 0x143   :  { %1556 = vmatprep.subr.bf16.mxu0 %v1845_v6 }
 0x1f8   :  { %v127_v40 = vpop.f32.mrb[0].mxu0 }
 0x1f9   :  { %v131_v41 = vmul.f32 %v127_v40, %v127_v40  ;;  %v1168_v42 = vpop.f32.mrb[1].mxu0 }
 0x1fb   :  { %v132_v43 = vsel %vm44_vm0, %v131_v41, 0.0 }
 0x1fc   :  { %133 = vadd.xlane.f32.xlu0 %v132_v43 }
 0x289   :  { %v134_v44 = vpop.xlane.xlu0 %133 }
 0x28a   :  { %v135_v45 = vrot.slane %v134_v44, 4 }
 0x28c   :  { %v136_v46 = vadd.f32 %v135_v45, %v134_v44 }
 0x28e   :  { %v137_v47 = vrot.slane %v136_v46, 2 }
 0x290   :  { %v138_v48 = vadd.f32 %v137_v47, %v136_v46 }
 0x292   :  { %v139_v49 = vrot.slane %v138_v48, 1 }
 0x294   :  { %v140_v50 = vadd.f32 %v139_v49, %v138_v48 }
 0x296   :  { %1728 = vpush %v140_v50 }
 0x2c7   :  { %s1729_s27 = spop %1728 }
 0x2c8   :  { %s142_s28 = smax.f32 %s1848_s1, %s1729_s27 }
 0x2c9   :  { %v143_v51 = vstv %s142_s28  ;;  %s1849_s28 = smov 1e-12  }
 0x2ca   :  { %1784 = vrsqrt.f32 %v143_v51 }
 0x2d4   :  { %v1785_v52 = vpop.eup %1784 }
 0x2d5   :  { %1730 = vpush %v1785_v52 }
 0x306   :  { %s1731_s29 = spop %1730 }
 0x307   :  { %v146_v53 = vstv %s1731_s29 }
 0x308   :  { %v147_v54 = vmul.f32 %v146_v53, %v127_v40 }
 0x30a   :  { %1202 = vmatmul.mubr.f32.vlgmr.msra.gmra.mrb[0].mxu1 %v147_v54 }
 0x30b   :  { %1582 = vmatpush3.bf16.msra.mxu1 %v1888_v7  ;;  %1306 = vmatprep.mubr.msk.f32.mxu1 %vm1846_vm1, %v1847_v29 }
 0x30c   :  { %1583 = vmatprep.subr.bf16.mxu1 %v1845_v6 }
 0x30f   :  { %1585 = vmatpush3.bf16.msra.mxu1 %v1892_v9 }
 0x310   :  { %1586 = vmatprep.subr.bf16.mxu1 %v1845_v6 }
 0x313   :  { %1588 = vmatpush3.bf16.msra.mxu1 %v1898_v12 }
 0x314   :  { %1589 = vmatprep.subr.bf16.mxu1 %v1845_v6 }
 0x317   :  { %1591 = vmatpush3.bf16.msra.mxu1 %v1902_v15 }
 0x318   :  { %1592 = vmatprep.subr.bf16.mxu1 %v1845_v6 }
 0x31b   :  { %1594 = vmatpush3.bf16.msra.mxu1 %v1908_v18 }
 0x31c   :  { %1595 = vmatprep.subr.bf16.mxu1 %v1845_v6 }
 0x31f   :  { %1597 = vmatpush3.bf16.msra.mxu1 %v1912_v21 }
 0x320   :  { %1598 = vmatprep.subr.bf16.mxu1 %v1845_v6 }
 0x323   :  { %1600 = vmatpush3.bf16.msra.mxu1 %v1918_v24 }
 0x324   :  { %1601 = vmatprep.subr.bf16.mxu1 %v1845_v6 }
 0x327   :  { %1603 = vmatpush3.bf16.msra.mxu1 %v1929_v27 }
 0x328   :  { %1604 = vmatprep.subr.bf16.mxu1 %v1845_v6 }
 0x3dd   :  { %v214_v55 = vpop.f32.mrb[0].mxu1 }
 0x3de   :  { %v1203_v56 = vpop.f32.mrb[1].mxu1  ;;  %v218_v57 = vmul.f32 %v214_v55, %v214_v55 }
 0x3e0   :  { %v219_v58 = vsel %vm44_vm0, %v218_v57, 0.0 }
 0x3e1   :  { %220 = vadd.xlane.f32.xlu1 %v219_v58 }
 0x46e   :  { %v221_v59 = vpop.xlane.xlu1 %220 }
 0x46f   :  { %v222_v60 = vrot.slane %v221_v59, 4 }
 0x471   :  { %v223_v61 = vadd.f32 %v222_v60, %v221_v59 }
 0x473   :  { %v224_v62 = vrot.slane %v223_v61, 2 }
 0x475   :  { %v225_v63 = vadd.f32 %v224_v62, %v223_v61 }
 0x477   :  { %v226_v0 = vrot.slane %v225_v63, 1 }
 0x479   :  { %v227_v1 = vadd.f32 %v226_v0, %v225_v63 }
 0x47b   :  { %1732 = vpush %v227_v1 }
 0x4ac   :  { %s1733_s30 = spop %1732 }
 0x4ad   :  { %s229_s3 = smax.f32 %s1848_s1, %s1733_s30 }
 0x4ae   :  { %v230_v2 = vstv %s229_s3 }
 0x4af   :  { %1786 = vrsqrt.f32 %v230_v2 }
 0x4b9   :  { %v1787_v3 = vpop.eup %1786 }
 0x4ba   :  { %1734 = vpush %v1787_v3 }
 0x4eb   :  { %s1735_s4 = spop %1734 }
 0x4ec   :  { %v233_v4 = vstv %s1735_s4  ;;  %s1850_s4 = smov 1.0  }
 0x4ed   :  { %v234_v5 = vmul.f32 %v233_v4, %v214_v55 }
 0x4ef   :  { %1237 = vmatmul.mubr.f32.vlgmr.msra.gmra.mrb[2].mxu0 %v234_v5 }
 0x4f0   :  { %1558 = vmatpush3.bf16.xpose.msra.mxu0 %v1888_v7  ;;  %1271 = vmatprep.mubr.msk.f32.mxu0 %vm1846_vm1, %v1847_v29 }
 0x4f1   :  { %1559 = vmatprep.subr.bf16.mxu0 %v1845_v6 }
 0x4f8   :  { %1561 = vmatpush3.bf16.xpose.msra.mxu0 %v1892_v9 }
 0x4f9   :  { %1562 = vmatprep.subr.bf16.mxu0 %v1845_v6 }
 0x500   :  { %1564 = vmatpush3.bf16.xpose.msra.mxu0 %v1898_v12 }
 0x501   :  { %1565 = vmatprep.subr.bf16.mxu0 %v1845_v6 }
 0x508   :  { %1567 = vmatpush3.bf16.xpose.msra.mxu0 %v1902_v15 }
 0x509   :  { %1568 = vmatprep.subr.bf16.mxu0 %v1845_v6 }
 0x510   :  { %1570 = vmatpush3.bf16.xpose.msra.mxu0 %v1908_v18 }
 0x511   :  { %1571 = vmatprep.subr.bf16.mxu0 %v1845_v6 }
 0x518   :  { %1573 = vmatpush3.bf16.xpose.msra.mxu0 %v1912_v21 }
 0x519   :  { %1574 = vmatprep.subr.bf16.mxu0 %v1845_v6 }
 0x520   :  { %1576 = vmatpush3.bf16.xpose.msra.mxu0 %v1918_v24 }
 0x521   :  { %1577 = vmatprep.subr.bf16.mxu0 %v1845_v6 }
 0x528   :  { %1579 = vmatpush3.bf16.xpose.msra.mxu0 %v1929_v27 }
 0x529   :  { %1628 = vmatprep.subr.bf16.mxu0 %v1845_v6 }
 0x5c2   :  { %v301_v8 = vpop.f32.mrb[2].mxu0 }
 0x5c3   :  { %v305_v10 = vmul.f32 %v301_v8, %v301_v8  ;;  %v1238_v11 = vpop.f32.mrb[3].mxu0 }
 0x5c5   :  { %v306_v13 = vsel %vm44_vm0, %v305_v10, 0.0 }
 0x5c6   :  { %307 = vadd.xlane.f32.xlu1 %v306_v13 }
 0x653   :  { %v308_v14 = vpop.xlane.xlu1 %307 }
 0x654   :  { %v309_v16 = vrot.slane %v308_v14, 4 }
 0x656   :  { %v310_v17 = vadd.f32 %v309_v16, %v308_v14 }
 0x658   :  { %v311_v19 = vrot.slane %v310_v17, 2 }
 0x65a   :  { %v312_v20 = vadd.f32 %v311_v19, %v310_v17 }
 0x65c   :  { %v313_v22 = vrot.slane %v312_v20, 1 }
 0x65e   :  { %v314_v23 = vadd.f32 %v313_v22, %v312_v20 }
 0x660   :  { %1736 = vpush %v314_v23 }
 0x691   :  { %s1737_s5 = spop %1736 }
 0x692   :  { %s316_s6 = smax.f32 %s1848_s1, %s1737_s5 }
 0x693   :  { %v317_v25 = vstv %s316_s6 }
 0x694   :  { %1788 = vrsqrt.f32 %v317_v25 }
 0x69e   :  { %v1789_v26 = vpop.eup %1788 }
 0x69f   :  { %1738 = vpush %v1789_v26 }
 0x6d0   :  { %s1739_s7 = spop %1738 }
 0x6d1   :  { %v320_v28 = vstv %s1739_s7 }
 0x6d2   :  { %v321_v30 = vmul.f32 %v320_v28, %v301_v8 }
 0x6d4   :  { %1272 = vmatmul.mubr.f32.vlgmr.msra.gmra.mrb[4].mxu0 %v321_v30 }
 0x6d5   :  { %1630 = vmatpush3.bf16.msra.mxu0 %v1888_v7  ;;  %1376 = vmatprep.mubr.msk.f32.mxu0 %vm1846_vm1, %v1847_v29 }
 0x6d6   :  { %1631 = vmatprep.subr.bf16.mxu0 %v1845_v6 }
 0x6d9   :  { %1633 = vmatpush3.bf16.msra.mxu0 %v1892_v9 }
 0x6da   :  { %1634 = vmatprep.subr.bf16.mxu0 %v1845_v6 }
 0x6dd   :  { %1636 = vmatpush3.bf16.msra.mxu0 %v1898_v12 }
 0x6de   :  { %1637 = vmatprep.subr.bf16.mxu0 %v1845_v6 }
 0x6e1   :  { %1639 = vmatpush3.bf16.msra.mxu0 %v1902_v15 }
 0x6e2   :  { %1640 = vmatprep.subr.bf16.mxu0 %v1845_v6 }
 0x6e5   :  { %1642 = vmatpush3.bf16.msra.mxu0 %v1908_v18 }
 0x6e6   :  { %1643 = vmatprep.subr.bf16.mxu0 %v1845_v6 }
 0x6e9   :  { %1645 = vmatpush3.bf16.msra.mxu0 %v1912_v21 }
 0x6ea   :  { %1646 = vmatprep.subr.bf16.mxu0 %v1845_v6 }
 0x6ed   :  { %1648 = vmatpush3.bf16.msra.mxu0 %v1918_v24 }
 0x6ee   :  { %1649 = vmatprep.subr.bf16.mxu0 %v1845_v6 }
 0x6f1   :  { %1651 = vmatpush3.bf16.msra.mxu0 %v1929_v27 }
 0x6f2   :  { %1652 = vmatprep.subr.bf16.mxu0 %v1845_v6 }
 0x7a7   :  { %v388_v31 = vpop.f32.mrb[4].mxu0 }
 0x7a8   :  { %v392_v32 = vmul.f32 %v388_v31, %v388_v31  ;;  %v1273_v33 = vpop.f32.mrb[5].mxu0 }
 0x7aa   :  { %v393_v34 = vsel %vm44_vm0, %v392_v32, 0.0 }
 0x7ab   :  { %394 = vadd.xlane.f32.xlu0 %v393_v34 }
 0x838   :  { %v395_v35 = vpop.xlane.xlu0 %394 }
 0x839   :  { %v396_v36 = vrot.slane %v395_v35, 4 }
 0x83b   :  { %v397_v37 = vadd.f32 %v396_v36, %v395_v35 }
 0x83d   :  { %v398_v38 = vrot.slane %v397_v37, 2 }
 0x83f   :  { %v399_v39 = vadd.f32 %v398_v38, %v397_v37 }
 0x841   :  { %v400_v40 = vrot.slane %v399_v39, 1 }
 0x843   :  { %v401_v41 = vadd.f32 %v400_v40, %v399_v39 }
 0x845   :  { %1740 = vpush %v401_v41 }
 0x876   :  { %s1741_s8 = spop %1740 }
 0x877   :  { %s403_s9 = smax.f32 %s1848_s1, %s1741_s8  ;;  %s1828_s8 = scalar_lea.hbm %s2120_s2, 16 }
 0x878   :  { %v404_v42 = vstv %s403_s9  ;;  %p1829_p8 = scmp.ne.s32.totalorder %s2120_s2, %s1828_s8  ;;  %p1832_p9 = scmp.lt.u32.totalorder %s1828_s8, %s2120_s2 }
 0x879   :  { %1790 = vrsqrt.f32 %v404_v42 }
 0x87a   :  { %p1834_p10 = pnand %p1832_p9, %p1829_p8 }
 0x883   :  { %v1791_v43 = vpop.eup %1790 }
 0x884   :  { %1742 = vpush %v1791_v43 }
 0x8b5   :  { %s1743_s10 = spop %1742 }
 0x8b6   :  { %v407_v44 = vstv %s1743_s10 }
 0x8b7   :  { %v408_v45 = vmul.f32 %v407_v44, %v388_v31 }
 0x8b9   :  { %1307 = vmatmul.mubr.f32.vlgmr.msra.gmra.mrb[2].mxu1 %v408_v45 }
 0x8ba   :  { %1606 = vmatpush3.bf16.xpose.msra.mxu1 %v1888_v7  ;;  %1341 = vmatprep.mubr.msk.f32.mxu1 %vm1846_vm1, %v1847_v29 }
 0x8bb   :  { %1607 = vmatprep.subr.bf16.mxu1 %v1845_v6 }
 0x8c2   :  { %1609 = vmatpush3.bf16.xpose.msra.mxu1 %v1892_v9 }
 0x8c3   :  { %1610 = vmatprep.subr.bf16.mxu1 %v1845_v6 }
 0x8ca   :  { %1612 = vmatpush3.bf16.xpose.msra.mxu1 %v1898_v12 }
 0x8cb   :  { %1613 = vmatprep.subr.bf16.mxu1 %v1845_v6 }
 0x8d2   :  { %1615 = vmatpush3.bf16.xpose.msra.mxu1 %v1902_v15 }
 0x8d3   :  { %1616 = vmatprep.subr.bf16.mxu1 %v1845_v6 }
 0x8da   :  { %1618 = vmatpush3.bf16.xpose.msra.mxu1 %v1908_v18 }
 0x8db   :  { %1619 = vmatprep.subr.bf16.mxu1 %v1845_v6 }
 0x8e2   :  { %1621 = vmatpush3.bf16.xpose.msra.mxu1 %v1912_v21 }
 0x8e3   :  { %1622 = vmatprep.subr.bf16.mxu1 %v1845_v6 }
 0x8ea   :  { %1624 = vmatpush3.bf16.xpose.msra.mxu1 %v1918_v24 }
 0x8eb   :  { %1625 = vmatprep.subr.bf16.mxu1 %v1845_v6 }
 0x8f2   :  { %1627 = vmatpush3.bf16.xpose.msra.mxu1 %v1929_v27 }
 0x8f3   :  { %1676 = vmatprep.subr.bf16.mxu1 %v1845_v6 }
 0x98c   :  { %v475_v46 = vpop.f32.mrb[2].mxu1 }
 0x98d   :  { %v479_v47 = vmul.f32 %v475_v46, %v475_v46  ;;  %v1308_v48 = vpop.f32.mrb[3].mxu1 }
 0x98f   :  { %v480_v49 = vsel %vm44_vm0, %v479_v47, 0.0 }
 0x990   :  { %481 = vadd.xlane.f32.xlu1 %v480_v49 }
 0xa1d   :  { %v482_v50 = vpop.xlane.xlu1 %481 }
 0xa1e   :  { %v483_v51 = vrot.slane %v482_v50, 4 }
 0xa20   :  { %v484_v52 = vadd.f32 %v483_v51, %v482_v50 }
 0xa22   :  { %v485_v53 = vrot.slane %v484_v52, 2 }
 0xa24   :  { %v486_v54 = vadd.f32 %v485_v53, %v484_v52 }
 0xa26   :  { %v487_v55 = vrot.slane %v486_v54, 1 }
 0xa28   :  { %v488_v56 = vadd.f32 %v487_v55, %v486_v54 }
 0xa2a   :  { %1744 = vpush %v488_v56 }
 0xa5b   :  { %s1745_s11 = spop %1744 }
 0xa5c   :  { %s490_s12 = smax.f32 %s1848_s1, %s1745_s11 }
 0xa5d   :  { %v491_v57 = vstv %s490_s12 }
 0xa5e   :  { %1792 = vrsqrt.f32 %v491_v57 }
 0xa68   :  { %v1793_v58 = vpop.eup %1792 }
 0xa69   :  { %1746 = vpush %v1793_v58 }
 0xa9a   :  { %s1747_s13 = spop %1746 }
 0xa9b   :  { %v494_v59 = vstv %s1747_s13 }
 0xa9c   :  { %v495_v60 = vmul.f32 %v494_v59, %v475_v46 }
 0xa9e   :  { %1342 = vmatmul.mubr.f32.vlgmr.msra.gmra.mrb[4].mxu1 %v495_v60 }
 0xa9f   :  { %1678 = vmatpush3.bf16.msra.mxu1 %v1888_v7  ;;  %1446 = vmatprep.mubr.msk.f32.mxu1 %vm1846_vm1, %v1847_v29 }
 0xaa0   :  { %1679 = vmatprep.subr.bf16.mxu1 %v1845_v6 }
 0xaa3   :  { %1681 = vmatpush3.bf16.msra.mxu1 %v1892_v9 }
 0xaa4   :  { %1682 = vmatprep.subr.bf16.mxu1 %v1845_v6 }
 0xaa7   :  { %1684 = vmatpush3.bf16.msra.mxu1 %v1898_v12 }
 0xaa8   :  { %1685 = vmatprep.subr.bf16.mxu1 %v1845_v6 }
 0xaab   :  { %1687 = vmatpush3.bf16.msra.mxu1 %v1902_v15 }
 0xaac   :  { %1688 = vmatprep.subr.bf16.mxu1 %v1845_v6 }
 0xaaf   :  { %1690 = vmatpush3.bf16.msra.mxu1 %v1908_v18 }
 0xab0   :  { %1691 = vmatprep.subr.bf16.mxu1 %v1845_v6 }
 0xab3   :  { %1693 = vmatpush3.bf16.msra.mxu1 %v1912_v21 }
 0xab4   :  { %1694 = vmatprep.subr.bf16.mxu1 %v1845_v6 }
 0xab7   :  { %1696 = vmatpush3.bf16.msra.mxu1 %v1918_v24 }
 0xab8   :  { %1697 = vmatprep.subr.bf16.mxu1 %v1845_v6 }
 0xabb   :  { %1699 = vmatpush3.bf16.msra.mxu1 %v1929_v27 }
 0xabc   :  { %1700 = vmatprep.subr.bf16.mxu1 %v1845_v6 }
 0xb71   :  { %v562_v61 = vpop.f32.mrb[4].mxu1 }
 0xb72   :  { %v566_v62 = vmul.f32 %v562_v61, %v562_v61  ;;  %v1343_v63 = vpop.f32.mrb[5].mxu1 }
 0xb74   :  { %v567_v0 = vsel %vm44_vm0, %v566_v62, 0.0 }
 0xb75   :  { %568 = vadd.xlane.f32.xlu0 %v567_v0 }
 0xc02   :  { %v569_v1 = vpop.xlane.xlu0 %568 }
 0xc03   :  { %v570_v2 = vrot.slane %v569_v1, 4 }
 0xc05   :  { %v571_v3 = vadd.f32 %v570_v2, %v569_v1 }
 0xc07   :  { %v572_v4 = vrot.slane %v571_v3, 2 }
 0xc09   :  { %v573_v5 = vadd.f32 %v572_v4, %v571_v3 }
 0xc0b   :  { %v574_v8 = vrot.slane %v573_v5, 1 }
 0xc0d   :  { %v575_v10 = vadd.f32 %v574_v8, %v573_v5 }
 0xc0f   :  { %1748 = vpush %v575_v10 }
 0xc40   :  { %s1749_s14 = spop %1748 }
 0xc41   :  { %s577_s15 = smax.f32 %s1848_s1, %s1749_s14 }
 0xc42   :  { %v578_v11 = vstv %s577_s15 }
 0xc43   :  { %1794 = vrsqrt.f32 %v578_v11 }
 0xc4d   :  { %v1795_v13 = vpop.eup %1794 }
 0xc4e   :  { %1750 = vpush %v1795_v13 }
 0xc7f   :  { %s1751_s16 = spop %1750 }
 0xc80   :  { %v581_v14 = vstv %s1751_s16 }
 0xc81   :  { %v582_v16 = vmul.f32 %v581_v14, %v562_v61 }
 0xc83   :  { %1377 = vmatmul.mubr.f32.vlgmr.msra.gmra.mrb[6].mxu0 %v582_v16 }
 0xc84   :  { %1654 = vmatpush3.bf16.xpose.msra.mxu0 %v1888_v7  ;;  %1411 = vmatprep.mubr.msk.f32.mxu0 %vm1846_vm1, %v1847_v29 }
 0xc85   :  { %1655 = vmatprep.subr.bf16.mxu0 %v1845_v6 }
 0xc8c   :  { %1657 = vmatpush3.bf16.xpose.msra.mxu0 %v1892_v9 }
 0xc8d   :  { %1658 = vmatprep.subr.bf16.mxu0 %v1845_v6 }
 0xc94   :  { %1660 = vmatpush3.bf16.xpose.msra.mxu0 %v1898_v12 }
 0xc95   :  { %1661 = vmatprep.subr.bf16.mxu0 %v1845_v6 }
 0xc9c   :  { %1663 = vmatpush3.bf16.xpose.msra.mxu0 %v1902_v15 }
 0xc9d   :  { %1664 = vmatprep.subr.bf16.mxu0 %v1845_v6 }
 0xca4   :  { %1666 = vmatpush3.bf16.xpose.msra.mxu0 %v1908_v18 }
 0xca5   :  { %1667 = vmatprep.subr.bf16.mxu0 %v1845_v6 }
 0xcac   :  { %1669 = vmatpush3.bf16.xpose.msra.mxu0 %v1912_v21 }
 0xcad   :  { %1670 = vmatprep.subr.bf16.mxu0 %v1845_v6 }
 0xcb4   :  { %1672 = vmatpush3.bf16.xpose.msra.mxu0 %v1918_v24 }
 0xcb5   :  { %1673 = vmatprep.subr.bf16.mxu0 %v1845_v6 }
 0xcbc   :  { %1675 = vmatpush3.bf16.xpose.msra.mxu0 %v1929_v27 }
 0xd56   :  { %v649_v17 = vpop.f32.mrb[6].mxu0 }
 0xd57   :  { %v653_v19 = vmul.f32 %v649_v17, %v649_v17  ;;  %v1378_v20 = vpop.f32.mrb[7].mxu0 }
 0xd59   :  { %v654_v22 = vsel %vm44_vm0, %v653_v19, 0.0 }
 0xd5a   :  { %655 = vadd.xlane.f32.xlu1 %v654_v22 }
 0xde7   :  { %v656_v23 = vpop.xlane.xlu1 %655 }
 0xde8   :  { %v657_v25 = vrot.slane %v656_v23, 4 }
 0xdea   :  { %v658_v26 = vadd.f32 %v657_v25, %v656_v23 }
 0xdec   :  { %v659_v28 = vrot.slane %v658_v26, 2 }
 0xdee   :  { %v660_v30 = vadd.f32 %v659_v28, %v658_v26 }
 0xdf0   :  { %v661_v31 = vrot.slane %v660_v30, 1 }
 0xdf2   :  { %v662_v32 = vadd.f32 %v661_v31, %v660_v30 }
 0xdf4   :  { %1752 = vpush %v662_v32 }
 0xe25   :  { %s1753_s17 = spop %1752 }
 0xe26   :  { %s664_s18 = smax.f32 %s1848_s1, %s1753_s17 }
 0xe27   :  { %v665_v33 = vstv %s664_s18 }
 0xe28   :  { %1796 = vrsqrt.f32 %v665_v33 }
 0xe32   :  { %v1797_v34 = vpop.eup %1796 }
 0xe33   :  { %1754 = vpush %v1797_v34 }
 0xe64   :  { %s1755_s19 = spop %1754 }
 0xe65   :  { %v668_v35 = vstv %s1755_s19 }
 0xe66   :  { %v669_v36 = vmul.f32 %v668_v35, %v649_v17 }
 0xe68   :  { %1412 = vmatmul.mubr.f32.vlgmr.msra.gmra.mrb[8].mxu0 %v669_v36 }
 0xf3b   :  { %v736_v37 = vpop.f32.mrb[8].mxu0 }
 0xf3c   :  { %v740_v38 = vmul.f32 %v736_v37, %v736_v37  ;;  %v1413_v39 = vpop.f32.mrb[9].mxu0 }
 0xf3e   :  { %v741_v40 = vsel %vm44_vm0, %v740_v38, 0.0 }
 0xf3f   :  { %742 = vadd.xlane.f32.xlu0 %v741_v40 }
 0xfcc   :  { %v743_v41 = vpop.xlane.xlu0 %742 }
 0xfcd   :  { %v744_v42 = vrot.slane %v743_v41, 4 }
 0xfcf   :  { %v745_v43 = vadd.f32 %v744_v42, %v743_v41 }
 0xfd1   :  { %v746_v44 = vrot.slane %v745_v43, 2 }
 0xfd3   :  { %v747_v45 = vadd.f32 %v746_v44, %v745_v43 }
 0xfd5   :  { %v748_v46 = vrot.slane %v747_v45, 1 }
 0xfd7   :  { %v749_v47 = vadd.f32 %v748_v46, %v747_v45 }
 0xfd9   :  { %1756 = vpush %v749_v47 }
0x100a   :  { %s1757_s20 = spop %1756 }
0x100b   :  { %s751_s21 = smax.f32 %s1848_s1, %s1757_s20 }
0x100c   :  { %v752_v48 = vstv %s751_s21 }
0x100d   :  { %1798 = vrsqrt.f32 %v752_v48 }
0x1017   :  { %v1799_v49 = vpop.eup %1798 }
0x1018   :  { %1758 = vpush %v1799_v49 }
0x1049   :  { %s1759_s22 = spop %1758 }
0x104a   :  { %v755_v50 = vstv %s1759_s22 }
0x104b   :  { %v756_v51 = vmul.f32 %v755_v50, %v736_v37 }
0x104d   :  { %1447 = vmatmul.mubr.f32.vlgmr.msra.gmra.mrb[6].mxu1 %v756_v51 }
0x104e   :  { %1702 = vmatpush3.bf16.xpose.msra.mxu1 %v1888_v7  ;;  %1481 = vmatprep.mubr.msk.f32.mxu1 %vm1846_vm1, %v1847_v29 }
0x104f   :  { %1703 = vmatprep.subr.bf16.mxu1 %v1845_v6 }
0x1056   :  { %1705 = vmatpush3.bf16.xpose.msra.mxu1 %v1892_v9 }
0x1057   :  { %1706 = vmatprep.subr.bf16.mxu1 %v1845_v6 }
0x105e   :  { %1708 = vmatpush3.bf16.xpose.msra.mxu1 %v1898_v12 }
0x105f   :  { %1709 = vmatprep.subr.bf16.mxu1 %v1845_v6 }
0x1066   :  { %1711 = vmatpush3.bf16.xpose.msra.mxu1 %v1902_v15 }
0x1067   :  { %1712 = vmatprep.subr.bf16.mxu1 %v1845_v6 }
0x106e   :  { %1714 = vmatpush3.bf16.xpose.msra.mxu1 %v1908_v18 }
0x106f   :  { %1715 = vmatprep.subr.bf16.mxu1 %v1845_v6 }
0x1076   :  { %1717 = vmatpush3.bf16.xpose.msra.mxu1 %v1912_v21 }
0x1077   :  { %1718 = vmatprep.subr.bf16.mxu1 %v1845_v6 }
0x107e   :  { %1720 = vmatpush3.bf16.xpose.msra.mxu1 %v1918_v24 }
0x107f   :  { %1721 = vmatprep.subr.bf16.mxu1 %v1845_v6 }
0x1086   :  { %1723 = vmatpush3.bf16.xpose.msra.mxu1 %v1929_v27 }
0x1120   :  { %v823_v7 = vpop.f32.mrb[6].mxu1 }
0x1121   :  { %v827_v9 = vmul.f32 %v823_v7, %v823_v7  ;;  %v1448_v12 = vpop.f32.mrb[7].mxu1 }
0x1123   :  { %v828_v15 = vsel %vm44_vm0, %v827_v9, 0.0 }
0x1124   :  { %829 = vadd.xlane.f32.xlu1 %v828_v15 }
0x11b1   :  { %v830_v29 = vpop.xlane.xlu1 %829 }
0x11b2   :  { %v831_v18 = vrot.slane %v830_v29, 4 }
0x11b4   :  { %v832_v52 = vadd.f32 %v831_v18, %v830_v29 }
0x11b6   :  { %v833_v53 = vrot.slane %v832_v52, 2 }
0x11b8   :  { %v834_v54 = vadd.f32 %v833_v53, %v832_v52 }
0x11ba   :  { %v835_v21 = vrot.slane %v834_v54, 1 }
0x11bc   :  { %v836_v55 = vadd.f32 %v835_v21, %v834_v54 }
0x11be   :  { %1760 = vpush %v836_v55 }
0x11ef   :  { %s1761_s23 = spop %1760 }
0x11f0   :  { %s838_s24 = smax.f32 %s1848_s1, %s1761_s23 }
0x11f1   :  { %v839_v6 = vstv %s838_s24 }
0x11f2   :  { %1800 = vrsqrt.f32 %v839_v6 }
0x11fc   :  { %v1801_v24 = vpop.eup %1800 }
0x11fd   :  { %1762 = vpush %v1801_v24 }
0x122e   :  { %s1763_s0 = spop %1762 }
0x122f   :  { %v842_v27 = vstv %s1763_s0 }
0x1230   :  { %v843_v56 = vmul.f32 %v842_v27, %v823_v7 }
0x1232   :  { %1482 = vmatmul.mubr.f32.vlgmr.msra.gmra.mrb[8].mxu1 %v843_v56 }
0x1305   :  { %v910_v57 = vpop.f32.mrb[8].mxu1 }
0x1306   :  { %v1483_v58 = vpop.f32.mrb[9].mxu1  ;;  %v914_v59 = vmul.f32 %v910_v57, %v910_v57 }
0x1308   :  { %v915_v60 = vsel %vm44_vm0, %v914_v59, 0.0 }
0x1309   :  { %916 = vadd.xlane.f32.xlu0 %v915_v60 }
0x1396   :  { %v917_v61 = vpop.xlane.xlu0 %916 }
0x1397   :  { %v918_v62 = vrot.slane %v917_v61, 4 }
0x1399   :  { %v919_v63 = vadd.f32 %v918_v62, %v917_v61 }
0x139b   :  { %v920_v0 = vrot.slane %v919_v63, 2 }
0x139d   :  { %v921_v1 = vadd.f32 %v920_v0, %v919_v63 }
0x139f   :  { %v922_v2 = vrot.slane %v921_v1, 1 }
0x13a1   :  { %v923_v3 = vadd.f32 %v922_v2, %v921_v1 }
0x13a3   :  { %1764 = vpush %v923_v3 }
0x13d4   :  { %s1765_s25 = spop %1764 }
0x13d5   :  { %s925_s26 = smax.f32 %s1848_s1, %s1765_s25 }
0x13d6   :  { %v926_v4 = vstv %s925_s26 }
0x13d7   :  { %1802 = vrsqrt.f32 %v926_v4 }
0x13e1   :  { %v1803_v5 = vpop.eup %1802 }
0x13e2   :  { %1766 = vpush %v1803_v5 }
0x1413   :  { %s1767_s27 = spop %1766 }
0x1414   :  { %v929_v8 = vstv %s1767_s27 }
0x1415   :  { %v930_v10 = vmul.f32 %v929_v8, %v910_v57 }
0x1417   :  { %v931_v11 = vmul.f32 %v930_v10, %v910_v57 }
0x1419   :  { %v932_v13 = vsel %vm44_vm0, %v931_v11, 0.0 }
0x141a   :  { %933 = vadd.xlane.f32.xlu1 %v932_v13 }
0x14a7   :  { %v934_v14 = vpop.xlane.xlu1 %933 }
0x14a8   :  { %v935_v16 = vrot.slane %v934_v14, 4 }
0x14aa   :  { %v936_v17 = vadd.f32 %v935_v16, %v934_v14 }
0x14ac   :  { %v937_v19 = vrot.slane %v936_v17, 2 }
0x14ae   :  { %v938_v20 = vadd.f32 %v937_v19, %v936_v17 }
0x14b0   :  { %v939_v22 = vrot.slane %v938_v20, 1 }
0x14b2   :  { %v940_v23 = vadd.f32 %v939_v22, %v938_v20 }
0x14b4   :  { %1768 = vpush %v940_v23 }
0x14e5   :  { %s1769_s1 = spop %1768 }
0x14e6   :  { %s942_s29 = smax.f32 %s1849_s28, %s1769_s1 }
0x14e7   :  { %v943_v25 = vstv %s942_s29 }
0x14e8   :  { %1804 = vrcp.f32 %v943_v25 }
0x14f2   :  { %v1805_v26 = vpop.eup %1804 }
0x14f3   :  { %1770 = vpush %v1805_v26 }
0x1524   :  { %s1771_s30 = spop %1770 }
0x1525   :  { %s946_s3 = smul.f32 0.9, %s1771_s30 }
0x1527   :  { %s947_s5 = smin.f32 %s1850_s4, %s946_s3 }
0x1528   :  { %949 = sst [smem:[#allocation5]] %s947_s5 }
0x1529   :  { %1837 = shalt.err (!%p1834_p10)
}
0x152a   :  { %s1851_s13 = smov [#allocation5]  }
0x152b   :  { %957 = dma.smem_to_hbm %s1851_s13, 16, %s2120_s2, [#allocation4]  }
0x152c   :  { %1840 = dma.done.wait [#allocation4], 16  }
0x152d   :  { %1841 = vsyncadd [#allocation4], 4294967280 }
0x152e   :  { %961 = sfence }
0x152f   :  { %962 = vsyncpa [#allocation3], 1 }
0x1530   :  { %963 = vsyncpa [#allocation4], 1 }

</bundles_post_ra>
